<compile_context>
chip_gen: v6e
topology: v6e:2x2x1
jax: 0.10.0
libtpu: 0.0.40
codegen_flags: <defaults>
</compile_context>

<pallas_src>
import jax
import jax.numpy as jnp
from jax import lax
from jax.experimental import pallas as pl
from jax.experimental.pallas import tpu as pltpu

MAX_N = 21
H_NF = 100   # forced by the module's hardcoded .view(batch_size, 21, 100)
HP = 128     # lane-padded feature dim used inside the kernel
N2 = MAX_N * MAX_N  # 441 pair rows per batch element


def pair_features_kernel(node_ref, edge_ref, we_t_ref, be_ref, wi_t_ref,
                         pqsel_ref, out_ref):
    # Blocks:
    #   node_ref : (nb, MAX_N, HP)
    #   edge_ref : (nb, N2,   HP)   (pairs flattened: row = p*MAX_N + q)
    #   we_t_ref : (HP, HP), wi_t_ref : (HP, HP), be_ref : (1, HP)
    #   pqsel_ref: (N2, MAX_N)  with pqsel[p*MAX_N+q, k] = (k==p) + (k==q)
    #   out_ref  : (nb, N2, HP)
    nb = node_ref.shape[0]

    we_t = we_t_ref[...]
    wi_t = wi_t_ref[...]
    be = be_ref[...]
    pqsel = pqsel_ref[...]

    def body(b, carry):
        # f_ij = edge_attr @ W_e^T          -> (N2, HP), M=441 fills the MXU
        f_ij = jnp.dot(edge_ref[b], we_t, preferred_element_type=jnp.float32)
        # f_i = node_feats @ W_i^T          -> (MAX_N, HP)
        f_i = jnp.dot(node_ref[b], wi_t, preferred_element_type=jnp.float32)
        # f_i[b, q] + f_i[b, p] for every pair row, via one selection matmul.
        # (Reproduces the upstream bug: the "f_j" term is f_i, W_j is never used.)
        f_pq = jnp.dot(pqsel, f_i, preferred_element_type=jnp.float32)
        out_ref[b] = jnp.maximum(f_ij + be + f_pq, 0.0).astype(out_ref.dtype)
        return carry

    lax.fori_loop(0, nb, body, 0)


def pair_features_layer(node_feats, edge_attr, batch_size, params, *, nb=8):
    """node_feats: (batch_size*MAX_N, H_NF), edge_attr: (batch_size*MAX_N**2, H_NF).
    Returns (batch_size*MAX_N**2, H_NF), matching the PyTorch module."""
    h = H_NF
    nb = max(1, min(nb, batch_size))
    nblocks = pl.cdiv(batch_size, nb)
    bp = nblocks * nb  # batch padded to a multiple of nb

    # --- wrapper-side layout plumbing (pad feature dim to 128 lanes, pad batch) ---
    node3 = node_feats.reshape(batch_size, MAX_N, h)
    edge3 = edge_attr.reshape(batch_size, N2, h)
    node3 = jnp.pad(node3, ((0, bp - batch_size), (0, 0), (0, HP - h)))
    edge3 = jnp.pad(edge3, ((0, bp - batch_size), (0, 0), (0, HP - h)))

    we_t = jnp.pad(params["we"].T, ((0, HP - h), (0, HP - h)))
    wi_t = jnp.pad(params["wi"].T, ((0, HP - h), (0, HP - h)))
    be = jnp.pad(params["be"], (0, HP - h)).reshape(1, HP)
    # NOTE: params["wj"] is intentionally NOT passed to the kernel — the original
    # forward computes f_j = node_j_layer(node_feats) and then discards it
    # (reuses f_i), so W_j never affects the output.

    # Selection matrix (P + Q): row p*MAX_N+q picks f_i[p] + f_i[q].
    r = jnp.arange(N2)
    k = jnp.arange(MAX_N)
    pqsel = ((r[:, None] // MAX_N == k[None, :]).astype(jnp.float32)
             + (r[:, None] % MAX_N == k[None, :]).astype(jnp.float32))  # (N2, MAX_N)

    out = pl.pallas_call(
        pair_features_kernel,
        out_shape=jax.ShapeDtypeStruct((bp, N2, HP), node_feats.dtype),
        grid_spec=pltpu.PrefetchScalarGridSpec(
            num_scalar_prefetch=0,
            grid=(nblocks,),
            in_specs=[
                pl.BlockSpec((nb, MAX_N, HP), lambda i: (i, 0, 0)),   # node feats
                pl.BlockSpec((nb, N2, HP), lambda i: (i, 0, 0)),      # edge attr (pairs flat)
                pl.BlockSpec((HP, HP), lambda i: (0, 0)),             # W_e^T
                pl.BlockSpec((1, HP), lambda i: (0, 0)),              # b_e
                pl.BlockSpec((HP, HP), lambda i: (0, 0)),             # W_i^T
                pl.BlockSpec((N2, MAX_N), lambda i: (0, 0)),          # P+Q selection
            ],
            out_specs=pl.BlockSpec((nb, N2, HP), lambda i: (i, 0, 0)),
        ),
        compiler_params=pltpu.CompilerParams(
            dimension_semantics=("parallel",),
            vmem_limit_bytes=32 * 1024 * 1024,
        ),
    )(node3, edge3, we_t, be, wi_t, pqsel)

    out = out[:batch_size, :, :h]
    return out.reshape(batch_size * N2, h)


def pair_features_ref(node_feats, edge_attr, batch_size, params):
    """Pure-JAX reference mirroring the PyTorch forward (including the f_j bug)."""
    h = H_NF
    f_ij = edge_attr @ params["we"].T + params["be"]
    f_i = node_feats @ params["wi"].T
    _f_j_unused = node_feats @ params["wj"].T  # computed then discarded, as in torch code
    f_ij = f_ij.reshape(batch_size, MAX_N, MAX_N, h)
    f_i3 = f_i.reshape(batch_size, MAX_N, h)
    s = jnp.maximum(f_ij + f_i3[:, None, :, :] + f_i3[:, :, None, :], 0.0)
    return s.reshape(batch_size * MAX_N * MAX_N, h)


if __name__ == "__main__":
    key = jax.random.PRNGKey(0)
    k_nf, k_ea, k_we, k_be, k_wi, k_wj = jax.random.split(key, 6)

    batch_size = 2
    h = H_NF
    node_feats = jax.random.normal(k_nf, (batch_size * MAX_N, h), jnp.float32)
    edge_attr = jax.random.normal(k_ea, (batch_size * MAX_N * MAX_N, h), jnp.float32)

    bound = 1.0 / float(jnp.sqrt(float(h)))  # PyTorch Linear default init range
    params = {
        "we": jax.random.uniform(k_we, (h, h), jnp.float32, -bound, bound),
        "be": jax.random.uniform(k_be, (h,), jnp.float32, -bound, bound),
        "wi": jax.random.uniform(k_wi, (h, h), jnp.float32, -bound, bound),
        "wj": jax.random.uniform(k_wj, (h, h), jnp.float32, -bound, bound),
    }

    out = pair_features_layer(node_feats, edge_attr, batch_size, params)
    out = jax.block_until_ready(out)

    ref = pair_features_ref(node_feats, edge_attr, batch_size, params)
    assert out.shape == (batch_size * MAX_N * MAX_N, h)
    err = float(jnp.max(jnp.abs(out - ref)))
    assert jnp.allclose(out, ref, rtol=1e-3, atol=1e-3), err
    print("KERNEL_OK")
</pallas_src>

<mosaic_0001>
module attributes {stable_mosaic.version = 11 : i64} {
  func.func @pair_features_kernel(%arg0: i32, %arg1: memref<2x21x128xf32, #tpu.memory_space<vmem>>, %arg2: memref<2x441x128xf32, #tpu.memory_space<vmem>>, %arg3: memref<128x128xf32, #tpu.memory_space<vmem>>, %arg4: memref<1x128xf32, #tpu.memory_space<vmem>>, %arg5: memref<128x128xf32, #tpu.memory_space<vmem>>, %arg6: memref<441x21xf32, #tpu.memory_space<vmem>>, %arg7: memref<2x441x128xf32, #tpu.memory_space<vmem>>) attributes {dimension_semantics = [#tpu.dimension_semantics<parallel>], iteration_bounds = array<i64: 1>, scalar_prefetch = 0 : i64, scratch_operands = 0 : i64, tpu.core_type = #tpu.core_type<tc>, window_params = [{transform_indices = @transform_0, window_bounds = array<i64: 2, 21, 128>}, {transform_indices = @transform_1, window_bounds = array<i64: 2, 441, 128>}, {pipeline_mode = #tpu.pipeline_mode<synchronous>, transform_indices = @transform_2, window_bounds = array<i64: 128, 128>}, {pipeline_mode = #tpu.pipeline_mode<synchronous>, transform_indices = @transform_3, window_bounds = array<i64: 1, 128>}, {pipeline_mode = #tpu.pipeline_mode<synchronous>, transform_indices = @transform_4, window_bounds = array<i64: 128, 128>}, {pipeline_mode = #tpu.pipeline_mode<synchronous>, transform_indices = @transform_5, window_bounds = array<i64: 441, 21>}, {transform_indices = @transform_6, window_bounds = array<i64: 2, 441, 128>}]} {
    %c0 = arith.constant 0 : index
    %c0_0 = arith.constant 0 : index
    %0 = vector.load %arg3[%c0, %c0_0] : memref<128x128xf32, #tpu.memory_space<vmem>>, vector<128x128xf32>
    %c0_1 = arith.constant 0 : index
    %c0_2 = arith.constant 0 : index
    %1 = vector.load %arg5[%c0_1, %c0_2] : memref<128x128xf32, #tpu.memory_space<vmem>>, vector<128x128xf32>
    %c0_3 = arith.constant 0 : index
    %c0_4 = arith.constant 0 : index
    %2 = vector.load %arg4[%c0_3, %c0_4] : memref<1x128xf32, #tpu.memory_space<vmem>>, vector<1x128xf32>
    %c0_5 = arith.constant 0 : index
    %c0_6 = arith.constant 0 : index
    %3 = vector.load %arg6[%c0_5, %c0_6] : memref<441x21xf32, #tpu.memory_space<vmem>>, vector<441x21xf32>
    %c0_i32 = arith.constant 0 : i32
    %c2_i32 = arith.constant 2 : i32
    %4 = arith.addi %c0_i32, %c2_i32 : i32
    %c1_i32 = arith.constant 1 : i32
    scf.for %arg8 = %c0_i32 to %4 step %c1_i32  : i32 {
      %5 = arith.index_cast %arg8 : i32 to index
      %c0_8 = arith.constant 0 : index
      %c0_9 = arith.constant 0 : index
      %6 = vector.load %arg2[%5, %c0_8, %c0_9] : memref<2x441x128xf32, #tpu.memory_space<vmem>>, vector<1x441x128xf32>
      %7 = vector.shape_cast %6 : vector<1x441x128xf32> to vector<441x128xf32>
      %cst = arith.constant dense<0.000000e+00> : vector<441x128xf32>
      %8 = tpu.matmul %7, %0, %cst {dimension_numbers = #tpu.dot_dimension_numbers<[1], [0], [0], [1], [0, 0, 1, 1], [], []>} : vector<441x128xf32>, vector<128x128xf32>, vector<441x128xf32> -> vector<441x128xf32>
      %9 = arith.index_cast %arg8 : i32 to index
      %c0_10 = arith.constant 0 : index
      %c0_11 = arith.constant 0 : index
      %10 = vector.load %arg1[%9, %c0_10, %c0_11] : memref<2x21x128xf32, #tpu.memory_space<vmem>>, vector<1x21x128xf32>
      %11 = vector.shape_cast %10 : vector<1x21x128xf32> to vector<21x128xf32>
      %cst_12 = arith.constant dense<0.000000e+00> : vector<21x128xf32>
      %12 = tpu.matmul %11, %1, %cst_12 {dimension_numbers = #tpu.dot_dimension_numbers<[1], [0], [0], [1], [0, 0, 1, 1], [], []>} : vector<21x128xf32>, vector<128x128xf32>, vector<21x128xf32> -> vector<21x128xf32>
      %cst_13 = arith.constant dense<0.000000e+00> : vector<441x128xf32>
      %13 = tpu.matmul %3, %12, %cst_13 {dimension_numbers = #tpu.dot_dimension_numbers<[1], [0], [0], [1], [0, 0, 1, 1], [], []>} : vector<441x21xf32>, vector<21x128xf32>, vector<441x128xf32> -> vector<441x128xf32>
      %14 = vector.broadcast %2 : vector<1x128xf32> to vector<441x128xf32>
      %15 = arith.addf %8, %14 : vector<441x128xf32>
      %16 = arith.addf %15, %13 : vector<441x128xf32>
      %cst_14 = arith.constant 0.000000e+00 : f32
      %17 = vector.broadcast %cst_14 : f32 to vector<441x128xf32>
      %18 = arith.maximumf %16, %17 : vector<441x128xf32>
      %19 = arith.index_cast %arg8 : i32 to index
      %c0_15 = arith.constant 0 : index
      %c0_16 = arith.constant 0 : index
      %20 = vector.load %arg7[%19, %c0_15, %c0_16] : memref<2x441x128xf32, #tpu.memory_space<vmem>>, vector<1x441x128xf32>
      %21 = vector.shape_cast %20 : vector<1x441x128xf32> to vector<441x128xf32>
      %22 = vector.shape_cast %18 : vector<441x128xf32> to vector<1x441x128xf32>
      tpu.vector_store %arg7[%19, %c0_15, %c0_16], %22 {strides = array<i32>} : memref<2x441x128xf32, #tpu.memory_space<vmem>>, vector<1x441x128xf32>,
    }
    %c2_i32_7 = arith.constant 2 : i32
    return
  }
  func.func @transform_0(%arg0: i32) -> (i32, i32, i32) {
    %c0_i32 = arith.constant 0 : i32
    %c0_i32_0 = arith.constant 0 : i32
    %c0_i32_1 = arith.constant 0 : i32
    return %arg0, %c0_i32, %c0_i32_0 : i32, i32, i32
  }
  func.func @transform_1(%arg0: i32) -> (i32, i32, i32) {
    %c0_i32 = arith.constant 0 : i32
    %c0_i32_0 = arith.constant 0 : i32
    %c0_i32_1 = arith.constant 0 : i32
    return %arg0, %c0_i32, %c0_i32_0 : i32, i32, i32
  }
  func.func @transform_2(%arg0: i32) -> (i32, i32) {
    %c0_i32 = arith.constant 0 : i32
    %c0_i32_0 = arith.constant 0 : i32
    %c0_i32_1 = arith.constant 0 : i32
    return %c0_i32, %c0_i32_0 : i32, i32
  }
  func.func @transform_3(%arg0: i32) -> (i32, i32) {
    %c0_i32 = arith.constant 0 : i32
    %c0_i32_0 = arith.constant 0 : i32
    %c0_i32_1 = arith.constant 0 : i32
    return %c0_i32, %c0_i32_0 : i32, i32
  }
  func.func @transform_4(%arg0: i32) -> (i32, i32) {
    %c0_i32 = arith.constant 0 : i32
    %c0_i32_0 = arith.constant 0 : i32
    %c0_i32_1 = arith.constant 0 : i32
    return %c0_i32, %c0_i32_0 : i32, i32
  }
  func.func @transform_5(%arg0: i32) -> (i32, i32) {
    %c0_i32 = arith.constant 0 : i32
    %c0_i32_0 = arith.constant 0 : i32
    %c0_i32_1 = arith.constant 0 : i32
    return %c0_i32, %c0_i32_0 : i32, i32
  }
  func.func @transform_6(%arg0: i32) -> (i32, i32, i32) {
    %c0_i32 = arith.constant 0 : i32
    %c0_i32_0 = arith.constant 0 : i32
    %c0_i32_1 = arith.constant 0 : i32
    return %arg0, %c0_i32, %c0_i32_0 : i32, i32, i32
  }
}

</mosaic_0001>

<bundles_post_ra>
// kernel: tpu_custom_call.1
= control target key start
LH: loop header
LB: loop body
LE: loop exit
PB: predicated region body
PF: predicated region fallthrough
CT: control target
= control target key end

     0   :  { %s2301_s17 = smov 0   ;;  %s2760_s0 = inlined_call_operand.vmem [shape: f32[2,21,128], index: 0, kind: input, shape index: {}]   ;;  %s2761_s1 = inlined_call_operand.vmem [shape: f32[2,441,128], index: 1, kind: input, shape index: {}]   ;;  %s2762_s2 = inlined_call_operand.vmem [shape: f32[128,128], index: 2, kind: input, shape index: {}]   ;;  %s2763_s6 = inlined_call_operand.vmem [shape: f32[2,441,128], index: 6, kind: output, shape index: {}]   ;;  %s2764_s4 = inlined_call_operand.vmem [shape: f32[128,128], index: 4, kind: input, shape index: {}]   ;;  %s2765_s3 = inlined_call_operand.vmem [shape: f32[1,128], index: 3, kind: input, shape index: {}]   ;;  %s2766_s5 = inlined_call_operand.vmem [shape: f32[441,21], index: 5, kind: input, shape index: {}]  }
   0x1   :  { %v1859_v0 = vld [vmem:[%s2762_s2] sm:$0xff]  ;;  %v1864_v1 = vld [vmem:[%s2762_s2 + $0x8] sm:$0xff]  ;;  %v1869_v2 = vld [vmem:[%s2762_s2 + $0x10] sm:$0xff] }
   0x2   :  { %2784 = vst [vmem:[#allocation2_spill] sm:$0xff] %v1859_v0  ;;  %2785 = vst [vmem:[#allocation3_spill] sm:$0xff] %v1864_v1  ;;  %v1874_v3 = vld [vmem:[%s2762_s2 + $0x18] sm:$0xff]  ;;  %v1879_v4 = vld [vmem:[%s2762_s2 + $0x20] sm:$0xff] }
   0x3   :  { %2786 = vst [vmem:[#allocation4_spill] sm:$0xff] %v1869_v2  ;;  %2787 = vst [vmem:[#allocation5_spill] sm:$0xff] %v1874_v3  ;;  %v1884_v5 = vld [vmem:[%s2762_s2 + $0x28] sm:$0xff]  ;;  %v1889_v6 = vld [vmem:[%s2762_s2 + $0x30] sm:$0xff] }
   0x4   :  { %2788 = vst [vmem:[#allocation6_spill] sm:$0xff] %v1879_v4  ;;  %2789 = vst [vmem:[#allocation7_spill] sm:$0xff] %v1884_v5  ;;  %v1894_v7 = vld [vmem:[%s2762_s2 + $0x38] sm:$0xff]  ;;  %v1899_v8 = vld [vmem:[%s2762_s2 + $0x40] sm:$0xff] }
   0x5   :  { %2790 = vst [vmem:[#allocation8_spill] sm:$0xff] %v1889_v6  ;;  %2791 = vst [vmem:[#allocation9_spill] sm:$0xff] %v1894_v7  ;;  %v1904_v9 = vld [vmem:[%s2762_s2 + $0x48] sm:$0xff]  ;;  %v1909_v10 = vld [vmem:[%s2762_s2 + $0x50] sm:$0xff] }
   0x6   :  { %2792 = vst [vmem:[#allocation10_spill] sm:$0xff] %v1899_v8  ;;  %2793 = vst [vmem:[#allocation11_spill] sm:$0xff] %v1904_v9  ;;  %v1914_v11 = vld [vmem:[%s2762_s2 + $0x58] sm:$0xff]  ;;  %v1919_v12 = vld [vmem:[%s2762_s2 + $0x60] sm:$0xff] }
   0x7   :  { %2794 = vst [vmem:[#allocation12_spill] sm:$0xff] %v1909_v10  ;;  %2795 = vst [vmem:[#allocation13_spill] sm:$0xff] %v1914_v11  ;;  %v1924_v13 = vld [vmem:[%s2762_s2 + $0x68] sm:$0xff]  ;;  %v1929_v14 = vld [vmem:[%s2762_s2 + $0x70] sm:$0xff] }
   0x8   :  { %2796 = vst [vmem:[#allocation14_spill] sm:$0xff] %v1919_v12  ;;  %2797 = vst [vmem:[#allocation15_spill] sm:$0xff] %v1924_v13  ;;  %v1934_v15 = vld [vmem:[%s2762_s2 + $0x78] sm:$0xff]  ;;  %v1939_v16 = vld [vmem:[%s2764_s4] sm:$0xff] }
   0x9   :  { %2798 = vst [vmem:[#allocation16_spill] sm:$0xff] %v1929_v14  ;;  %2799 = vst [vmem:[#allocation17_spill] sm:$0xff] %v1934_v15  ;;  %v1944_v17 = vld [vmem:[%s2764_s4 + $0x8] sm:$0xff]  ;;  %v1949_v18 = vld [vmem:[%s2764_s4 + $0x10] sm:$0xff] }
   0xa   :  { %2800 = vst [vmem:[#allocation18_spill] sm:$0xff] %v1939_v16  ;;  %2801 = vst [vmem:[#allocation19_spill] sm:$0xff] %v1944_v17  ;;  %v1954_v19 = vld [vmem:[%s2764_s4 + $0x18] sm:$0xff]  ;;  %v1959_v20 = vld [vmem:[%s2764_s4 + $0x20] sm:$0xff] }
   0xb   :  { %2802 = vst [vmem:[#allocation20_spill] sm:$0xff] %v1949_v18  ;;  %2803 = vst [vmem:[#allocation21_spill] sm:$0xff] %v1954_v19  ;;  %v1964_v21 = vld [vmem:[%s2764_s4 + $0x28] sm:$0xff]  ;;  %v1969_v22 = vld [vmem:[%s2764_s4 + $0x30] sm:$0xff] }
   0xc   :  { %2804 = vst [vmem:[#allocation22_spill] sm:$0xff] %v1959_v20  ;;  %2805 = vst [vmem:[#allocation23_spill] sm:$0xff] %v1964_v21  ;;  %v1974_v23 = vld [vmem:[%s2764_s4 + $0x38] sm:$0xff]  ;;  %v1979_v24 = vld [vmem:[%s2764_s4 + $0x40] sm:$0xff] }
   0xd   :  { %2806 = vst [vmem:[#allocation24_spill] sm:$0xff] %v1969_v22  ;;  %2807 = vst [vmem:[#allocation25_spill] sm:$0xff] %v1974_v23  ;;  %v1984_v25 = vld [vmem:[%s2764_s4 + $0x48] sm:$0xff]  ;;  %v1989_v26 = vld [vmem:[%s2764_s4 + $0x50] sm:$0xff] }
   0xe   :  { %2808 = vst [vmem:[#allocation26_spill] sm:$0xff] %v1979_v24  ;;  %2809 = vst [vmem:[#allocation27_spill] sm:$0xff] %v1984_v25  ;;  %v1994_v27 = vld [vmem:[%s2764_s4 + $0x58] sm:$0xff]  ;;  %v1999_v28 = vld [vmem:[%s2764_s4 + $0x60] sm:$0xff] }
   0xf   :  { %2810 = vst [vmem:[#allocation28_spill] sm:$0xff] %v1989_v26  ;;  %2811 = vst [vmem:[#allocation29_spill] sm:$0xff] %v1994_v27  ;;  %v2004_v29 = vld [vmem:[%s2764_s4 + $0x68] sm:$0xff]  ;;  %v2009_v30 = vld [vmem:[%s2764_s4 + $0x70] sm:$0xff] }
  0x10   :  { %2812 = vst [vmem:[#allocation30_spill] sm:$0xff] %v1999_v28  ;;  %2813 = vst [vmem:[#allocation31_spill] sm:$0xff] %v2004_v29  ;;  %v2014_v31 = vld [vmem:[%s2764_s4 + $0x78] sm:$0xff]  ;;  %v2019_v32 = vld [vmem:[%s2765_s3] ss:$0 sm:$0xff] }
  0x11   :  { %2814 = vst [vmem:[#allocation32_spill] sm:$0xff] %v2009_v30  ;;  %2815 = vst [vmem:[#allocation33_spill] sm:$0xff] %v2014_v31  ;;  %v2024_v33 = vld [vmem:[%s2766_s5] sm:$0xff]  ;;  %v2029_v34 = vld [vmem:[%s2766_s5 + $0x8] sm:$0xff] }
  0x12   :  { %2816 = vst [vmem:[#allocation34_spill] sm:$0xff] %v2019_v32  ;;  %2817 = vst [vmem:[#allocation35_spill] sm:$0xff] %v2024_v33  ;;  %v2034_v35 = vld [vmem:[%s2766_s5 + $0x10] sm:$0xff]  ;;  %v2039_v36 = vld [vmem:[%s2766_s5 + $0x18] sm:$0xff] }
  0x13   :  { %2818 = vst [vmem:[#allocation36_spill] sm:$0xff] %v2029_v34  ;;  %2819 = vst [vmem:[#allocation37_spill] sm:$0xff] %v2034_v35  ;;  %v2044_v37 = vld [vmem:[%s2766_s5 + $0x20] sm:$0xff]  ;;  %v2049_v38 = vld [vmem:[%s2766_s5 + $0x28] sm:$0xff] }
  0x14   :  { %v2054_v39 = vld [vmem:[%s2766_s5 + $0x30] sm:$0xff]  ;;  %v2059_v40 = vld [vmem:[%s2766_s5 + $0x38] sm:$0xff]  ;;  %v2064_v41 = vld [vmem:[%s2766_s5 + $0x40] sm:$0xff] }
  0x15   :  { %v2069_v42 = vld [vmem:[%s2766_s5 + $0x48] sm:$0xff]  ;;  %v2074_v43 = vld [vmem:[%s2766_s5 + $0x50] sm:$0xff]  ;;  %v2079_v44 = vld [vmem:[%s2766_s5 + $0x58] sm:$0xff] }
  0x16   :  { %v2084_v45 = vld [vmem:[%s2766_s5 + $0x60] sm:$0xff]  ;;  %v2089_v46 = vld [vmem:[%s2766_s5 + $0x68] sm:$0xff]  ;;  %v2094_v47 = vld [vmem:[%s2766_s5 + $0x70] sm:$0xff] }
  0x17   :  { %v2099_v48 = vld [vmem:[%s2766_s5 + $0x78] sm:$0xff]  ;;  %v2104_v49 = vld [vmem:[%s2766_s5 + $0x80] sm:$0xff]  ;;  %v2109_v50 = vld [vmem:[%s2766_s5 + $0x88] sm:$0xff] }
  0x18   :  { %v2114_v51 = vld [vmem:[%s2766_s5 + $0x90] sm:$0xff]  ;;  %v2119_v52 = vld [vmem:[%s2766_s5 + $0x98] sm:$0xff]  ;;  %v2124_v53 = vld [vmem:[%s2766_s5 + $0xa0] sm:$0xff] }
  0x19   :  { %v2129_v54 = vld [vmem:[%s2766_s5 + $0xa8] sm:$0xff]  ;;  %v2134_v55 = vld [vmem:[%s2766_s5 + $0xb0] sm:$0xff]  ;;  %v2139_v56 = vld [vmem:[%s2766_s5 + $0xb8] sm:$0xff] }
  0x1a   :  { %v2144_v57 = vld [vmem:[%s2766_s5 + $0xc0] sm:$0xff]  ;;  %v2149_v58 = vld [vmem:[%s2766_s5 + $0xc8] sm:$0xff]  ;;  %v2154_v59 = vld [vmem:[%s2766_s5 + $0xd0] sm:$0xff] }
  0x1b   :  { %v2159_v60 = vld [vmem:[%s2766_s5 + $0xd8] sm:$0xff]  ;;  %v2164_v61 = vld [vmem:[%s2766_s5 + $0xe0] sm:$0xff]  ;;  %v2169_v62 = vld [vmem:[%s2766_s5 + $0xe8] sm:$0xff] }
  0x1c   :  { %2820 = vst [vmem:[#allocation38_spill] sm:$0xff] %v2159_v60  ;;  %2821 = vst [vmem:[#allocation39_spill] sm:$0xff] %v2164_v61  ;;  %v2174_v63 = vld [vmem:[%s2766_s5 + $0xf0] sm:$0xff]  ;;  %v2179_v32 = vld [vmem:[%s2766_s5 + $0xf8] sm:$0xff] }
  0x1d   :  { %2822 = vst [vmem:[#allocation40_spill] sm:$0xff] %v2169_v62  ;;  %2823 = vst [vmem:[#allocation41_spill] sm:$0xff] %v2174_v63  ;;  %v2184_v60 = vld [vmem:[%s2766_s5 + $0x100] sm:$0xff]  ;;  %v2189_v61 = vld [vmem:[%s2766_s5 + $0x108] sm:$0xff] }
  0x1e   :  { %2824 = vst [vmem:[#allocation42_spill] sm:$0xff] %v2179_v32  ;;  %2825 = vst [vmem:[#allocation43_spill] sm:$0xff] %v2184_v60  ;;  %v2194_v62 = vld [vmem:[%s2766_s5 + $0x110] sm:$0xff]  ;;  %v2199_v63 = vld [vmem:[%s2766_s5 + $0x118] sm:$0xff] }
  0x1f   :  { %2826 = vst [vmem:[#allocation44_spill] sm:$0xff] %v2189_v61  ;;  %2827 = vst [vmem:[#allocation45_spill] sm:$0xff] %v2194_v62  ;;  %v2204_v32 = vld [vmem:[%s2766_s5 + $0x120] sm:$0xff]  ;;  %v2209_v60 = vld [vmem:[%s2766_s5 + $0x128] sm:$0xff] }
  0x20   :  { %2828 = vst [vmem:[#allocation46_spill] sm:$0xff] %v2199_v63  ;;  %2829 = vst [vmem:[#allocation47_spill] sm:$0xff] %v2204_v32  ;;  %v2214_v61 = vld [vmem:[%s2766_s5 + $0x130] sm:$0xff]  ;;  %v2219_v62 = vld [vmem:[%s2766_s5 + $0x138] sm:$0xff] }
  0x21   :  { %2830 = vst [vmem:[#allocation48_spill] sm:$0xff] %v2209_v60  ;;  %2831 = vst [vmem:[#allocation49_spill] sm:$0xff] %v2214_v61  ;;  %v2224_v63 = vld [vmem:[%s2766_s5 + $0x140] sm:$0xff]  ;;  %v2229_v32 = vld [vmem:[%s2766_s5 + $0x148] sm:$0xff] }
  0x22   :  { %2832 = vst [vmem:[#allocation50_spill] sm:$0xff] %v2219_v62  ;;  %2833 = vst [vmem:[#allocation51_spill] sm:$0xff] %v2224_v63  ;;  %v2234_v60 = vld [vmem:[%s2766_s5 + $0x150] sm:$0xff]  ;;  %v2239_v61 = vld [vmem:[%s2766_s5 + $0x158] sm:$0xff] }
  0x23   :  { %2834 = vst [vmem:[#allocation52_spill] sm:$0xff] %v2229_v32  ;;  %2835 = vst [vmem:[#allocation53_spill] sm:$0xff] %v2234_v60  ;;  %v2244_v62 = vld [vmem:[%s2766_s5 + $0x160] sm:$0xff]  ;;  %v2249_v63 = vld [vmem:[%s2766_s5 + $0x168] sm:$0xff] }
  0x24   :  { %2836 = vst [vmem:[#allocation54_spill] sm:$0xff] %v2239_v61  ;;  %2837 = vst [vmem:[#allocation55_spill] sm:$0xff] %v2244_v62  ;;  %v2254_v32 = vld [vmem:[%s2766_s5 + $0x170] sm:$0xff]  ;;  %v2259_v60 = vld [vmem:[%s2766_s5 + $0x178] sm:$0xff] }
  0x25   :  { %2838 = vst [vmem:[#allocation56_spill] sm:$0xff] %v2249_v63  ;;  %2839 = vst [vmem:[#allocation57_spill] sm:$0xff] %v2254_v32  ;;  %v2264_v61 = vld [vmem:[%s2766_s5 + $0x180] sm:$0xff]  ;;  %v2269_v62 = vld [vmem:[%s2766_s5 + $0x188] sm:$0xff] }
  0x26   :  { %2840 = vst [vmem:[#allocation58_spill] sm:$0xff] %v2259_v60  ;;  %2841 = vst [vmem:[#allocation59_spill] sm:$0xff] %v2264_v61  ;;  %v2274_v63 = vld [vmem:[%s2766_s5 + $0x190] sm:$0xff]  ;;  %v2279_v32 = vld [vmem:[%s2766_s5 + $0x198] sm:$0xff] }
  0x27   :  { %2842 = vst [vmem:[#allocation60_spill] sm:$0xff] %v2269_v62  ;;  %2843 = vst [vmem:[#allocation61_spill] sm:$0xff] %v2274_v63  ;;  %v2284_v60 = vld [vmem:[%s2766_s5 + $0x1a0] sm:$0xff]  ;;  %v2289_v61 = vld [vmem:[%s2766_s5 + $0x1a8] sm:$0xff] }
  0x28   :  { %2844 = vst [vmem:[#allocation62_spill] sm:$0xff] %v2279_v32  ;;  %2845 = vst [vmem:[#allocation63_spill] sm:$0xff] %v2284_v60  ;;  %v2294_v62 = vld [vmem:[%s2766_s5 + $0x1b0] sm:$0xff]  ;;  %v2299_v63 = vld [vmem:[%s2766_s5 + $0x1b8] sm:$0x1] }
  0x29 LB: > { %v2846_v15 = vld [vmem:[#allocation17_spill] sm:$0xff]  ;;  %v2847_v14 = vld [vmem:[#allocation16_spill] sm:$0xff]  ;;  %v2848_v13 = vld [vmem:[#allocation15_spill] sm:$0xff]  ;;  %v1819_v60 = vmov 0.0   ;;  %vm1820_vm0 = vmmov 0   ;;  %s176_s5 = smul.u32 24, %s1817_s17  ;;  %s1817_s17 = sphi %s2301_s17, %s117_s17  }
  0x2a   : > { %v2849_v12 = vld [vmem:[#allocation14_spill] sm:$0xff]  ;;  %v2850_v11 = vld [vmem:[#allocation13_spill] sm:$0xff]  ;;  %v2851_v10 = vld [vmem:[#allocation12_spill] sm:$0xff]  ;;  %1522 = vmatprep.subr.mxu0 %v1819_v60  ;;  %1554 = vmatprep.mubr.msk.f32.mxu0 %vm1820_vm0, %v1819_v60  ;;  %s118_s3 = smul.u32 448, %s1817_s17  ;;  %vm261_vm1 = vcmask 171008   ;;  %vm430_vm2 = vcmask 1044480  }
  0x2b   : > { %v2852_v9 = vld [vmem:[#allocation11_spill] sm:$0xff]  ;;  %v2853_v8 = vld [vmem:[#allocation10_spill] sm:$0xff]  ;;  %v2854_v7 = vld [vmem:[#allocation9_spill] sm:$0xff]  ;;  %s177_s19 = scalar_lea.vmem %s2760_s0, %s176_s5  ;;  %s117_s17 = sadd.s32 1, %s1817_s17  }
  0x2c   : > { %v2855_v6 = vld [vmem:[#allocation8_spill] sm:$0xff]  ;;  %v2856_v5 = vld [vmem:[#allocation7_spill] sm:$0xff]  ;;  %v2857_v4 = vld [vmem:[#allocation6_spill] sm:$0xff]  ;;  %s2367_s22 = scalar_lea.vmem %s2761_s1, %s118_s3  ;;  %s2601_s25 = scalar_lea.vmem %s2763_s6, %s118_s3 }
  0x2d   : > { %v2858_v3 = vld [vmem:[#allocation5_spill] sm:$0xff]  ;;  %v2859_v2 = vld [vmem:[#allocation4_spill] sm:$0xff]  ;;  %v2860_v1 = vld [vmem:[#allocation3_spill] sm:$0xff]  ;;  %p114_p0 = scmp.ge.s32.totalorder %s117_s17, 2  }
  0x2e   : > { %v2861_v0 = vld [vmem:[#allocation2_spill] sm:$0xff]  ;;  %v2862_v31 = vld [vmem:[#allocation33_spill] sm:$0xff]  ;;  %v2863_v30 = vld [vmem:[#allocation32_spill] sm:$0xff] }
  0x2f   : > { %1523 = vmatpush3.msra.mxu0 %v2862_v31  ;;  %v2864_v29 = vld [vmem:[#allocation31_spill] sm:$0xff]  ;;  %v2865_v28 = vld [vmem:[#allocation30_spill] sm:$0xff]  ;;  %v2866_v27 = vld [vmem:[#allocation29_spill] sm:$0xff] }
  0x30   : > { %1524 = vmatprep.subr.mxu0 %v1819_v60  ;;  %v2867_v26 = vld [vmem:[#allocation28_spill] sm:$0xff]  ;;  %v2868_v25 = vld [vmem:[#allocation27_spill] sm:$0xff]  ;;  %v2869_v24 = vld [vmem:[#allocation26_spill] sm:$0xff] }
  0x31   : > { %1525 = vmatpush3.msra.mxu0 %v2863_v30  ;;  %v2870_v23 = vld [vmem:[#allocation25_spill] sm:$0xff]  ;;  %v2871_v22 = vld [vmem:[#allocation24_spill] sm:$0xff]  ;;  %v2872_v21 = vld [vmem:[#allocation23_spill] sm:$0xff] }
  0x32   : > { %1526 = vmatprep.subr.mxu0 %v1819_v60  ;;  %v2873_v20 = vld [vmem:[#allocation22_spill] sm:$0xff]  ;;  %v2874_v19 = vld [vmem:[#allocation21_spill] sm:$0xff]  ;;  %v2875_v18 = vld [vmem:[#allocation20_spill] sm:$0xff] }
  0x33   : > { %1527 = vmatpush3.msra.mxu0 %v2864_v29  ;;  %v2876_v17 = vld [vmem:[#allocation19_spill] sm:$0xff]  ;;  %v2877_v16 = vld [vmem:[#allocation18_spill] sm:$0xff]  ;;  %v2879_v34 = vld [vmem:[#allocation36_spill] sm:$0xff] }
  0x34   : > { %1528 = vmatprep.subr.mxu0 %v1819_v60  ;;  %v2878_v33 = vld [vmem:[#allocation35_spill] sm:$0xff]  ;;  %v2880_v35 = vld [vmem:[#allocation37_spill] sm:$0xff]  ;;  %v2905_v32 = vld [vmem:[#allocation62_spill] sm:$0xff] }
  0x35   : > { %1529 = vmatpush3.msra.mxu0 %v2865_v28  ;;  %1569 = vmatprep.mubr.msk.f32.mxu1 %vm261_vm1, %v2878_v33 }
  0x36   : > { %1530 = vmatprep.subr.mxu0 %v1819_v60 }
  0x37   : > { %1531 = vmatpush3.msra.mxu0 %v2866_v27 }
  0x38   : > { %1532 = vmatprep.subr.mxu0 %v1819_v60 }
  0x39   : > { %1533 = vmatpush3.msra.mxu0 %v2867_v26 }
  0x3a   : > { %1534 = vmatprep.subr.mxu0 %v1819_v60 }
  0x3b   : > { %1535 = vmatpush3.msra.mxu0 %v2868_v25 }
  0x3c   : > { %1536 = vmatprep.subr.mxu0 %v1819_v60 }
  0x3d   : > { %1537 = vmatpush3.msra.mxu0 %v2869_v24  ;;  %v157_v24 = vld [vmem:[%s2367_s22 + $0x128] sm:$0xff] }
  0x3e   : > { %1538 = vmatprep.subr.mxu0 %v1819_v60 }
  0x3f   : > { %1539 = vmatpush3.msra.mxu0 %v2870_v23  ;;  %v156_v23 = vld [vmem:[%s2367_s22 + $0x120] sm:$0xff] }
  0x40   : > { %1540 = vmatprep.subr.mxu0 %v1819_v60 }
  0x41   : > { %1541 = vmatpush3.msra.mxu0 %v2871_v22  ;;  %v178_v22 = vld [vmem:[%s177_s19] sm:$0xff] }
  0x42   : > { %1542 = vmatprep.subr.mxu0 %v1819_v60 }
  0x43   : > { %1543 = vmatpush3.msra.mxu0 %v2872_v21  ;;  %v129_v21 = vld [vmem:[%s2367_s22 + $0x48] sm:$0xff] }
  0x44   : > { %1544 = vmatprep.subr.mxu0 %v1819_v60 }
  0x45   : > { %1545 = vmatpush3.msra.mxu0 %v2873_v20  ;;  %v128_v20 = vld [vmem:[%s2367_s22 + $0x40] sm:$0xff] }
  0x46   : > { %1546 = vmatprep.subr.mxu0 %v1819_v60 }
  0x47   : > { %1547 = vmatpush3.msra.mxu0 %v2874_v19  ;;  %v179_v19 = vld [vmem:[%s177_s19 + $0x8] sm:$0xff] }
  0x48   : > { %1548 = vmatprep.subr.mxu0 %v1819_v60 }
  0x49   : > { %1549 = vmatpush3.msra.mxu0 %v2875_v18  ;;  %v125_v18 = vld [vmem:[%s2367_s22 + $0x28] sm:$0xff] }
  0x4a   : > { %1550 = vmatprep.subr.mxu0 %v1819_v60 }
  0x4b   : > { %1551 = vmatpush3.msra.mxu0 %v2876_v17  ;;  %v180_v17 = vld [vmem:[%s177_s19 + $0x10] sm:$0x1f] }
  0x4c   : > { %1552 = vmatprep.subr.mxu0 %v1819_v60 }
  0x4d   : > { %1553 = vmatpush3.msra.mxu0 %v2877_v16  ;;  %v124_v16 = vld [vmem:[%s2367_s22 + $0x20] sm:$0xff] }
  0x4e   : > { %1555 = vmatmul.mubr.f32.vlgmr.msra.gmra.mxu0 %v178_v22  ;;  %1653 = vmatprep.subr.mxu0 %v2846_v15  ;;  %v122_v22 = vld [vmem:[%s2367_s22 + $0x10] sm:$0xff] }
  0x4f   : > { %1557 = vmatprep.mubr.msk.f32.mxu0 %vm1820_vm0, %v1819_v60  ;;  %1654 = vmatpush3.msra.mxu0 %v2846_v15 }
  0x50   : > { %1655 = vmatprep.subr.mxu0 %v2847_v14 }
  0x51   : > { %1656 = vmatpush3.msra.mxu0 %v2847_v14 }
  0x52   : > { %1558 = vmatmul.mubr.f32.gmra.mxu0 %v179_v19  ;;  %1657 = vmatprep.subr.mxu0 %v2848_v13  ;;  %v121_v19 = vld [vmem:[%s2367_s22 + $0x8] sm:$0xff] }
  0x53   : > { %1560 = vmatprep.mubr.msk.f32.mxu0 %vm1820_vm0, %v1819_v60  ;;  %1658 = vmatpush3.msra.mxu0 %v2848_v13  ;;  %v123_v60 = vld [vmem:[%s2367_s22 + $0x18] sm:$0xff] }
  0x54   : > { %1659 = vmatprep.subr.mxu0 %v2849_v12 }
  0x55   : > { %1660 = vmatpush3.msra.mxu0 %v2849_v12 }
  0x56   : > { %1561 = vmatmul.mubr.f32.gmra.mxu0 %v180_v17  ;;  %1661 = vmatprep.subr.mxu0 %v2850_v11  ;;  %v120_v17 = vld [vmem:[%s2367_s22] sm:$0xff] }
  0x57   : > { %1662 = vmatpush3.msra.mxu0 %v2850_v11  ;;  %1685 = vmatprep.mubr.f32.mxu0 %v120_v17  ;;  %v126_v17 = vld [vmem:[%s2367_s22 + $0x30] sm:$0xff] }
  0x58   : > { %1663 = vmatprep.subr.mxu0 %v2851_v10 }
  0x59   : > { %1664 = vmatpush3.msra.mxu0 %v2851_v10 }
  0x5a   : > { %1665 = vmatprep.subr.mxu0 %v2852_v9 }
  0x5b   : > { %1666 = vmatpush3.msra.mxu0 %v2852_v9 }
  0x5c   : > { %1667 = vmatprep.subr.mxu0 %v2853_v8 }
  0x5d   : > { %1668 = vmatpush3.msra.mxu0 %v2853_v8 }
  0x5e   : > { %1669 = vmatprep.subr.mxu0 %v2854_v7 }
  0x5f   : > { %1670 = vmatpush3.msra.mxu0 %v2854_v7 }
  0x60   : > { %1671 = vmatprep.subr.mxu0 %v2855_v6 }
  0x61   : > { %1672 = vmatpush3.msra.mxu0 %v2855_v6 }
  0x62   : > { %1673 = vmatprep.subr.mxu0 %v2856_v5 }
  0x63   : > { %1674 = vmatpush3.msra.mxu0 %v2856_v5 }
  0x64   : > { %1675 = vmatprep.subr.mxu0 %v2857_v4 }
  0x65   : > { %1676 = vmatpush3.msra.mxu0 %v2857_v4 }
  0x66   : > { %1677 = vmatprep.subr.mxu0 %v2858_v3 }
  0x67   : > { %1678 = vmatpush3.msra.mxu0 %v2858_v3 }
  0x68   : > { %1679 = vmatprep.subr.mxu0 %v2859_v2 }
  0x69   : > { %1680 = vmatpush3.msra.mxu0 %v2859_v2 }
  0x6a   : > { %1681 = vmatprep.subr.mxu0 %v2860_v1 }
  0x6b   : > { %1682 = vmatpush3.msra.mxu0 %v2860_v1 }
  0x6c   : > { %1683 = vmatprep.subr.mxu0 %v2861_v0 }
  0x6d   : > { %1684 = vmatpush3.msra.mxu0 %v2861_v0 }
  0x6e   : > { %1686 = vmatmul.mubr.f32.vlgmr.msra.gmra.mxu0 %v121_v19  ;;  %v127_v19 = vld [vmem:[%s2367_s22 + $0x38] sm:$0xff] }
  0x6f   : > { %1688 = vmatprep.mubr.f32.mxu0 %v122_v22  ;;  %v130_v22 = vld [vmem:[%s2367_s22 + $0x50] sm:$0xff] }
  0x72   : > { %1689 = vmatmul.mubr.f32.gmra.mxu0 %v123_v60  ;;  %v131_v60 = vld [vmem:[%s2367_s22 + $0x58] sm:$0xff] }
  0x73   : > { %1691 = vmatprep.mubr.f32.mxu0 %v124_v16  ;;  %v132_v16 = vld [vmem:[%s2367_s22 + $0x60] sm:$0xff] }
  0x76   : > { %1692 = vmatmul.mubr.f32.gmra.mxu0 %v125_v18  ;;  %v133_v18 = vld [vmem:[%s2367_s22 + $0x68] sm:$0xff] }
  0x77   : > { %1694 = vmatprep.mubr.f32.mxu0 %v126_v17  ;;  %v134_v17 = vld [vmem:[%s2367_s22 + $0x70] sm:$0xff] }
  0x7a   : > { %1695 = vmatmul.mubr.f32.gmra.mxu0 %v127_v19  ;;  %v135_v19 = vld [vmem:[%s2367_s22 + $0x78] sm:$0xff] }
  0x7b   : > { %1697 = vmatprep.mubr.f32.mxu0 %v128_v20  ;;  %v136_v20 = vld [vmem:[%s2367_s22 + $0x80] sm:$0xff] }
  0x7e   : > { %1698 = vmatmul.mubr.f32.gmra.mxu0 %v129_v21  ;;  %v137_v21 = vld [vmem:[%s2367_s22 + $0x88] sm:$0xff] }
  0x7f   : > { %1700 = vmatprep.mubr.f32.mxu0 %v130_v22  ;;  %v138_v22 = vld [vmem:[%s2367_s22 + $0x90] sm:$0xff] }
  0x82   : > { %1701 = vmatmul.mubr.f32.gmra.mxu0 %v131_v60  ;;  %v139_v60 = vld [vmem:[%s2367_s22 + $0x98] sm:$0xff] }
  0x83   : > { %1703 = vmatprep.mubr.f32.mxu0 %v132_v16  ;;  %v140_v16 = vld [vmem:[%s2367_s22 + $0xa0] sm:$0xff] }
  0x86   : > { %1704 = vmatmul.mubr.f32.gmra.mxu0 %v133_v18  ;;  %v141_v18 = vld [vmem:[%s2367_s22 + $0xa8] sm:$0xff] }
  0x87   : > { %1706 = vmatprep.mubr.f32.mxu0 %v134_v17  ;;  %v142_v17 = vld [vmem:[%s2367_s22 + $0xb0] sm:$0xff] }
  0x8a   : > { %1707 = vmatmul.mubr.f32.gmra.mxu0 %v135_v19  ;;  %v143_v19 = vld [vmem:[%s2367_s22 + $0xb8] sm:$0xff] }
  0x8b   : > { %1709 = vmatprep.mubr.f32.mxu0 %v136_v20  ;;  %v144_v20 = vld [vmem:[%s2367_s22 + $0xc0] sm:$0xff] }
  0x8e   : > { %1710 = vmatmul.mubr.f32.gmra.mxu0 %v137_v21  ;;  %v145_v21 = vld [vmem:[%s2367_s22 + $0xc8] sm:$0xff] }
  0x8f   : > { %1712 = vmatprep.mubr.f32.mxu0 %v138_v22  ;;  %v146_v22 = vld [vmem:[%s2367_s22 + $0xd0] sm:$0xff] }
  0x92   : > { %1713 = vmatmul.mubr.f32.gmra.mxu0 %v139_v60  ;;  %v147_v60 = vld [vmem:[%s2367_s22 + $0xd8] sm:$0xff] }
  0x93   : > { %1715 = vmatprep.mubr.f32.mxu0 %v140_v16  ;;  %v148_v16 = vld [vmem:[%s2367_s22 + $0xe0] sm:$0xff] }
  0x96   : > { %1716 = vmatmul.mubr.f32.gmra.mxu0 %v141_v18  ;;  %v149_v18 = vld [vmem:[%s2367_s22 + $0xe8] sm:$0xff] }
  0x97   : > { %1718 = vmatprep.mubr.f32.mxu0 %v142_v17  ;;  %v150_v17 = vld [vmem:[%s2367_s22 + $0xf0] sm:$0xff] }
  0x9a   : > { %1719 = vmatmul.mubr.f32.gmra.mxu0 %v143_v19  ;;  %v151_v19 = vld [vmem:[%s2367_s22 + $0xf8] sm:$0xff] }
  0x9b   : > { %1721 = vmatprep.mubr.f32.mxu0 %v144_v20  ;;  %v152_v20 = vld [vmem:[%s2367_s22 + $0x100] sm:$0xff] }
  0x9e   : > { %1722 = vmatmul.mubr.f32.gmra.mxu0 %v145_v21  ;;  %v153_v21 = vld [vmem:[%s2367_s22 + $0x108] sm:$0xff] }
  0x9f   : > { %1724 = vmatprep.mubr.f32.mxu0 %v146_v22  ;;  %v154_v22 = vld [vmem:[%s2367_s22 + $0x110] sm:$0xff] }
  0xa2   : > { %1725 = vmatmul.mubr.f32.gmra.mxu0 %v147_v60  ;;  %v155_v60 = vld [vmem:[%s2367_s22 + $0x118] sm:$0xff] }
  0xa3   : > { %1727 = vmatprep.mubr.f32.mxu0 %v148_v16  ;;  %v158_v16 = vld [vmem:[%s2367_s22 + $0x130] sm:$0xff] }
  0xa6   : > { %1728 = vmatmul.mubr.f32.gmra.mxu0 %v149_v18  ;;  %v159_v18 = vld [vmem:[%s2367_s22 + $0x138] sm:$0xff] }
  0xa7   : > { %1730 = vmatprep.mubr.f32.mxu0 %v150_v17  ;;  %v160_v17 = vld [vmem:[%s2367_s22 + $0x140] sm:$0xff] }
  0xaa   : > { %1731 = vmatmul.mubr.f32.gmra.mxu0 %v151_v19  ;;  %v161_v19 = vld [vmem:[%s2367_s22 + $0x148] sm:$0xff] }
  0xab   : > { %1733 = vmatprep.mubr.f32.mxu0 %v152_v20 }
  0xae   : > { %1734 = vmatmul.mubr.f32.gmra.mxu0 %v153_v21 }
  0xaf   : > { %1736 = vmatprep.mubr.f32.mxu0 %v154_v22 }
  0xb2   : > { %1737 = vmatmul.mubr.f32.gmra.mxu0 %v155_v60  ;;  %v2886_v60 = vld [vmem:[#allocation43_spill] sm:$0xff] }
  0xb3   : > { %1739 = vmatprep.mubr.f32.mxu0 %v156_v23  ;;  %v2881_v23 = vld [vmem:[#allocation38_spill] sm:$0xff] }
  0xb6   : > { %1740 = vmatmul.mubr.f32.gmra.mxu0 %v157_v24  ;;  %v2882_v24 = vld [vmem:[#allocation39_spill] sm:$0xff] }
  0xb7   : > { %1742 = vmatprep.mubr.f32.mxu0 %v158_v16  ;;  %v2887_v16 = vld [vmem:[#allocation44_spill] sm:$0xff] }
  0xba   : > { %1743 = vmatmul.mubr.f32.gmra.mxu0 %v159_v18  ;;  %v2888_v18 = vld [vmem:[#allocation45_spill] sm:$0xff] }
  0xbb   : > { %1745 = vmatprep.mubr.f32.mxu0 %v160_v17  ;;  %v2889_v17 = vld [vmem:[#allocation46_spill] sm:$0xff] }
  0xbe   : > { %1746 = vmatmul.mubr.f32.gmra.mxu0 %v161_v19  ;;  %v2890_v19 = vld [vmem:[#allocation47_spill] sm:$0xff] }
 0x10e   : > { %v247_v25 = vpop.f32.mrf.mxu0 }
 0x110   : > { %v1556_v26 = vpop.f32.mrf.mxu0 }
 0x111   : > { %v2884_v26 = vld [vmem:[#allocation41_spill] sm:$0xff] }
 0x112   : > { %v252_v20 = vpop.f32.mrf.mxu0 }
 0x114   : > { %v1559_v21 = vpop.f32.mrf.mxu0 }
 0x115   : > { %v2892_v21 = vld [vmem:[#allocation49_spill] sm:$0xff] }
 0x116   : > { %v257_v27 = vpop.f32.mrf.mxu0 }
 0x117   : > { %1563 = vmatprep.subr.msk.mxu1 %vm430_vm2, %v257_v27 }
 0x118   : > { %v1562_v22 = vpop.f32.mrf.mxu0  ;;  %1564 = vmatpush3.msk.msra.mxu1 %vm430_vm2, %v257_v27  ;;  %v2885_v27 = vld [vmem:[#allocation42_spill] sm:$0xff] }
 0x119   : > { %1565 = vmatprep.subr.mxu1 %v252_v20  ;;  %v2893_v22 = vld [vmem:[#allocation50_spill] sm:$0xff] }
 0x11a   : > { %1566 = vmatpush3.msra.mxu1 %v252_v20  ;;  %v2891_v20 = vld [vmem:[#allocation48_spill] sm:$0xff] }
 0x11b   : > { %1567 = vmatprep.subr.mxu1 %v247_v25 }
 0x11c   : > { %1568 = vmatpush3.msra.mxu1 %v247_v25  ;;  %v2883_v25 = vld [vmem:[#allocation40_spill] sm:$0xff] }
 0x11d   : > { %1570 = vmatmul.mubr.msk.f32.vlgmr.msra.gmra.mxu1 %vm261_vm1, %v2879_v34  ;;  %1769 = vmatprep.subr.mxu1 %v2846_v15 }
 0x11e   : > { %1785 = vmatpush3.msra.mxu1 %v2846_v15  ;;  %1572 = vmatprep.mubr.msk.f32.mxu1 %vm261_vm1, %v2880_v35 }
 0x11f   : > { %1770 = vmatprep.subr.mxu1 %v2847_v14 }
 0x120   : > { %1786 = vmatpush3.msra.mxu1 %v2847_v14 }
 0x121   : > { %1573 = vmatmul.mubr.msk.f32.gmra.mxu1 %vm261_vm1, %v2039_v36  ;;  %1771 = vmatprep.subr.mxu1 %v2848_v13 }
 0x122   : > { %1575 = vmatprep.mubr.msk.f32.mxu1 %vm261_vm1, %v2044_v37  ;;  %1787 = vmatpush3.msra.mxu1 %v2848_v13 }
 0x123   : > { %1772 = vmatprep.subr.mxu1 %v2849_v12 }
 0x124   : > { %1788 = vmatpush3.msra.mxu1 %v2849_v12 }
 0x125   : > { %1576 = vmatmul.mubr.msk.f32.gmra.mxu1 %vm261_vm1, %v2049_v38  ;;  %1773 = vmatprep.subr.mxu1 %v2850_v11 }
 0x126   : > { %1578 = vmatprep.mubr.msk.f32.mxu1 %vm261_vm1, %v2054_v39  ;;  %1789 = vmatpush3.msra.mxu1 %v2850_v11 }
 0x127   : > { %1774 = vmatprep.subr.mxu1 %v2851_v10 }
 0x128   : > { %1790 = vmatpush3.msra.mxu1 %v2851_v10 }
 0x129   : > { %1579 = vmatmul.mubr.msk.f32.gmra.mxu1 %vm261_vm1, %v2059_v40  ;;  %1775 = vmatprep.subr.mxu1 %v2852_v9 }
 0x12a   : > { %1581 = vmatprep.mubr.msk.f32.mxu1 %vm261_vm1, %v2064_v41  ;;  %1791 = vmatpush3.msra.mxu1 %v2852_v9  ;;  %v2907_v9 = vld [vmem:[#allocation34_spill] sm:$0xff] }
 0x12b   : > { %1776 = vmatprep.subr.mxu1 %v2853_v8 }
 0x12c   : > { %1792 = vmatpush3.msra.mxu1 %v2853_v8 }
 0x12d   : > { %1582 = vmatmul.mubr.msk.f32.gmra.mxu1 %vm261_vm1, %v2069_v42  ;;  %1777 = vmatprep.subr.mxu1 %v2854_v7 }
 0x12e   : > { %1584 = vmatprep.mubr.msk.f32.mxu1 %vm261_vm1, %v2074_v43  ;;  %1793 = vmatpush3.msra.mxu1 %v2854_v7 }
 0x12f   : > { %1778 = vmatprep.subr.mxu1 %v2855_v6 }
 0x130   : > { %1794 = vmatpush3.msra.mxu1 %v2855_v6 }
 0x131   : > { %1585 = vmatmul.mubr.msk.f32.gmra.mxu1 %vm261_vm1, %v2079_v44  ;;  %1779 = vmatprep.subr.mxu1 %v2856_v5 }
 0x132   : > { %1587 = vmatprep.mubr.msk.f32.mxu1 %vm261_vm1, %v2084_v45  ;;  %1795 = vmatpush3.msra.mxu1 %v2856_v5 }
 0x133   : > { %1780 = vmatprep.subr.mxu1 %v2857_v4 }
 0x134   : > { %1796 = vmatpush3.msra.mxu1 %v2857_v4 }
 0x135   : > { %1588 = vmatmul.mubr.msk.f32.gmra.mxu1 %vm261_vm1, %v2089_v46  ;;  %1781 = vmatprep.subr.mxu1 %v2858_v3 }
 0x136   : > { %1590 = vmatprep.mubr.msk.f32.mxu1 %vm261_vm1, %v2094_v47  ;;  %1797 = vmatpush3.msra.mxu1 %v2858_v3  ;;  %v175_v3 = vld [vmem:[%s2367_s22 + $0x1b8] sm:$0x1] }
 0x137   : > { %1782 = vmatprep.subr.mxu1 %v2859_v2 }
 0x138   : > { %1798 = vmatpush3.msra.mxu1 %v2859_v2 }
 0x139   : > { %1591 = vmatmul.mubr.msk.f32.gmra.mxu1 %vm261_vm1, %v2099_v48  ;;  %1783 = vmatprep.subr.mxu1 %v2860_v1 }
 0x13a   : > { %1593 = vmatprep.mubr.msk.f32.mxu1 %vm261_vm1, %v2104_v49  ;;  %1799 = vmatpush3.msra.mxu1 %v2860_v1 }
 0x13b   : > { %1784 = vmatprep.subr.mxu1 %v2861_v0 }
 0x13c   : > { %1800 = vmatpush3.msra.mxu1 %v2861_v0  ;;  %v172_v0 = vld [vmem:[%s2367_s22 + $0x1a0] sm:$0xff] }
 0x13d   : > { %1594 = vmatmul.mubr.msk.f32.gmra.mxu1 %vm261_vm1, %v2109_v50 }
 0x13e   : > { %1596 = vmatprep.mubr.msk.f32.mxu1 %vm261_vm1, %v2114_v51 }
 0x141   : > { %1597 = vmatmul.mubr.msk.f32.gmra.mxu1 %vm261_vm1, %v2119_v52 }
 0x142   : > { %1599 = vmatprep.mubr.msk.f32.mxu1 %vm261_vm1, %v2124_v53 }
 0x145   : > { %1600 = vmatmul.mubr.msk.f32.gmra.mxu1 %vm261_vm1, %v2129_v54 }
 0x146   : > { %1602 = vmatprep.mubr.msk.f32.mxu1 %vm261_vm1, %v2134_v55 }
 0x149   : > { %1603 = vmatmul.mubr.msk.f32.gmra.mxu1 %vm261_vm1, %v2139_v56 }
 0x14a   : > { %1605 = vmatprep.mubr.msk.f32.mxu1 %vm261_vm1, %v2144_v57 }
 0x14d   : > { %1606 = vmatmul.mubr.msk.f32.gmra.mxu1 %vm261_vm1, %v2149_v58 }
 0x14e   : > { %1608 = vmatprep.mubr.msk.f32.mxu1 %vm261_vm1, %v2154_v59 }
 0x151   : > { %1609 = vmatmul.mubr.msk.f32.gmra.mxu1 %vm261_vm1, %v2881_v23  ;;  %v2894_v23 = vld [vmem:[#allocation51_spill] sm:$0xff] }
 0x152   : > { %1611 = vmatprep.mubr.msk.f32.mxu1 %vm261_vm1, %v2882_v24  ;;  %v2895_v24 = vld [vmem:[#allocation52_spill] sm:$0xff] }
 0x155   : > { %1612 = vmatmul.mubr.msk.f32.gmra.mxu1 %vm261_vm1, %v2883_v25  ;;  %v2896_v25 = vld [vmem:[#allocation53_spill] sm:$0xff] }
 0x156   : > { %1614 = vmatprep.mubr.msk.f32.mxu1 %vm261_vm1, %v2884_v26  ;;  %v2897_v26 = vld [vmem:[#allocation54_spill] sm:$0xff] }
 0x159   : > { %1615 = vmatmul.mubr.msk.f32.gmra.mxu1 %vm261_vm1, %v2885_v27  ;;  %v2898_v27 = vld [vmem:[#allocation55_spill] sm:$0xff] }
 0x15a   : > { %1617 = vmatprep.mubr.msk.f32.mxu1 %vm261_vm1, %v2886_v60  ;;  %v2899_v60 = vld [vmem:[#allocation56_spill] sm:$0xff] }
 0x15d   : > { %1618 = vmatmul.mubr.msk.f32.gmra.mxu1 %vm261_vm1, %v2887_v16  ;;  %v2900_v16 = vld [vmem:[#allocation57_spill] sm:$0xff] }
 0x15e   : > { %1620 = vmatprep.mubr.msk.f32.mxu1 %vm261_vm1, %v2888_v18  ;;  %v2901_v18 = vld [vmem:[#allocation58_spill] sm:$0xff] }
 0x161   : > { %1621 = vmatmul.mubr.msk.f32.gmra.mxu1 %vm261_vm1, %v2889_v17  ;;  %v2902_v17 = vld [vmem:[#allocation59_spill] sm:$0xff] }
 0x162   : > { %1623 = vmatprep.mubr.msk.f32.mxu1 %vm261_vm1, %v2890_v19  ;;  %v2903_v19 = vld [vmem:[#allocation60_spill] sm:$0xff] }
 0x165   : > { %1624 = vmatmul.mubr.msk.f32.gmra.mxu1 %vm261_vm1, %v2891_v20  ;;  %v2904_v20 = vld [vmem:[#allocation61_spill] sm:$0xff] }
 0x166   : > { %1626 = vmatprep.mubr.msk.f32.mxu1 %vm261_vm1, %v2892_v21  ;;  %v2906_v21 = vld [vmem:[#allocation63_spill] sm:$0xff] }
 0x169   : > { %1627 = vmatmul.mubr.msk.f32.gmra.mxu1 %vm261_vm1, %v2893_v22  ;;  %v1687_v22 = vpop.f32.mrf.mxu0 }
 0x16a   : > { %1629 = vmatprep.mubr.msk.f32.mxu1 %vm261_vm1, %v2894_v23  ;;  %v162_v23 = vld [vmem:[%s2367_s22 + $0x150] sm:$0xff]  ;;  %v857_v10 = vadd.f32 %v1687_v22, %v2907_v9 }
 0x16d   : > { %1630 = vmatmul.mubr.msk.f32.gmra.mxu1 %vm261_vm1, %v2895_v24  ;;  %v851_v24 = vpop.f32.mrf.mxu0 }
 0x16e   : > { %1632 = vmatprep.mubr.msk.f32.mxu1 %vm261_vm1, %v2896_v25  ;;  %v163_v25 = vld [vmem:[%s2367_s22 + $0x158] sm:$0xff]  ;;  %v852_v11 = vadd.f32 %v2907_v9, %v851_v24 }
 0x171   : > { %1633 = vmatmul.mubr.msk.f32.gmra.mxu1 %vm261_vm1, %v2897_v26  ;;  %v164_v26 = vld [vmem:[%s2367_s22 + $0x160] sm:$0xff] }
 0x172   : > { %1635 = vmatprep.mubr.msk.f32.mxu1 %vm261_vm1, %v2898_v27  ;;  %v1690_v27 = vpop.f32.mrf.mxu0 }
 0x173   : > { %v867_v15 = vadd.f32 %v1690_v27, %v2907_v9 }
 0x175   : > { %1636 = vmatmul.mubr.msk.f32.gmra.mxu1 %vm261_vm1, %v2899_v60  ;;  %v165_v60 = vld [vmem:[%s2367_s22 + $0x168] sm:$0xff] }
 0x176   : > { %1638 = vmatprep.mubr.msk.f32.mxu1 %vm261_vm1, %v2900_v16  ;;  %v166_v16 = vld [vmem:[%s2367_s22 + $0x170] sm:$0xff] }
 0x179   : > { %1639 = vmatmul.mubr.msk.f32.gmra.mxu1 %vm261_vm1, %v2901_v18  ;;  %v861_v18 = vpop.f32.mrf.mxu0 }
 0x17a   : > { %1641 = vmatprep.mubr.msk.f32.mxu1 %vm261_vm1, %v2902_v17  ;;  %v167_v17 = vld [vmem:[%s2367_s22 + $0x178] sm:$0xff]  ;;  %v862_v24 = vadd.f32 %v2907_v9, %v861_v18 }
 0x17d   : > { %1642 = vmatmul.mubr.msk.f32.gmra.mxu1 %vm261_vm1, %v2903_v19  ;;  %v168_v19 = vld [vmem:[%s2367_s22 + $0x180] sm:$0xff] }
 0x17e   : > { %1644 = vmatprep.mubr.msk.f32.mxu1 %vm261_vm1, %v2904_v20  ;;  %v1693_v20 = vpop.f32.mrf.mxu0 }
 0x17f   : > { %v877_v27 = vadd.f32 %v1693_v20, %v2907_v9 }
 0x181   : > { %1645 = vmatmul.mubr.msk.f32.gmra.mxu1 %vm261_vm1, %v2905_v32 }
 0x182   : > { %1647 = vmatprep.mubr.msk.f32.mxu1 %vm261_vm1, %v2906_v21  ;;  %v169_v21 = vld [vmem:[%s2367_s22 + $0x188] sm:$0xff] }
 0x185   : > { %1648 = vmatmul.mubr.msk.f32.gmra.mxu1 %vm261_vm1, %v2289_v61 }
 0x186   : > { %1650 = vmatprep.mubr.msk.f32.mxu1 %vm261_vm1, %v2294_v62 }
 0x189   : > { %1651 = vmatmul.mubr.msk.f32.gmra.mxu1 %vm261_vm1, %v2299_v63 }
 0x18a   : > { %1748 = vmatprep.mubr.f32.mxu1 %v162_v23  ;;  %v170_v23 = vld [vmem:[%s2367_s22 + $0x190] sm:$0xff] }
 0x18d   : > { %1749 = vmatmul.mubr.f32.vlgmr.msra.gmra.mxu1 %v163_v25  ;;  %v871_v25 = vpop.f32.mrf.mxu0 }
 0x18e   : > { %1751 = vmatprep.mubr.f32.mxu1 %v164_v26  ;;  %v171_v26 = vld [vmem:[%s2367_s22 + $0x198] sm:$0xff] }
 0x18f   : > { %v1696_v1 = vpop.f32.mrf.mxu0 }
 0x191   : > { %1752 = vmatmul.mubr.f32.gmra.mxu1 %v165_v60  ;;  %v173_v60 = vld [vmem:[%s2367_s22 + $0x1a8] sm:$0xff]  ;;  %v881_v2 = vpop.f32.mrf.mxu0 }
 0x192   : > { %1754 = vmatprep.mubr.f32.mxu1 %v166_v16  ;;  %v174_v16 = vld [vmem:[%s2367_s22 + $0x1b0] sm:$0xff]  ;;  %v882_v20 = vadd.f32 %v2907_v9, %v881_v2 }
 0x195   : > { %1755 = vmatmul.mubr.f32.gmra.mxu1 %v167_v17  ;;  %v1699_v17 = vpop.f32.mrf.mxu0 }
 0x196   : > { %1757 = vmatprep.mubr.f32.mxu1 %v168_v19 }
 0x197   : > { %v891_v19 = vpop.f32.mrf.mxu0 }
 0x199   : > { %1758 = vmatmul.mubr.f32.gmra.mxu1 %v169_v21  ;;  %v1702_v4 = vpop.f32.mrf.mxu0 }
 0x19a   : > { %1760 = vmatprep.mubr.f32.mxu1 %v170_v23 }
 0x19b   : > { %v2569_v5 = vpop.f32.mrf.mxu0 }
 0x19d   : > { %1761 = vmatmul.mubr.f32.gmra.mxu1 %v171_v26  ;;  %v2571_v21 = vpop.f32.mrf.mxu0 }
 0x19e   : > { %1763 = vmatprep.mubr.f32.mxu1 %v172_v0 }
 0x19f   : > { %v2573_v23 = vpop.f32.mrf.mxu0 }
 0x1a1   : > { %1764 = vmatmul.mubr.f32.gmra.mxu1 %v173_v60  ;;  %v2575_v26 = vpop.f32.mrf.mxu0 }
 0x1a2   : > { %1766 = vmatprep.mubr.f32.mxu1 %v174_v16 }
 0x1a3   : > { %v2577_v0 = vpop.f32.mrf.mxu0 }
 0x1a5   : > { %1767 = vmatmul.mubr.f32.gmra.mxu1 %v175_v3  ;;  %v2579_v6 = vpop.f32.mrf.mxu0 }
 0x1a7   : > { %v2581_v60 = vpop.f32.mrf.mxu0 }
 0x1a9   : > { %v2583_v16 = vpop.f32.mrf.mxu0 }
 0x1ab   : > { %v2585_v3 = vpop.f32.mrf.mxu0 }
 0x1ad   : > { %v2587_v7 = vpop.f32.mrf.mxu0 }
 0x1af   : > { %v2589_v8 = vpop.f32.mrf.mxu0 }
 0x1b1   : > { %v2593_v13 = vpop.f32.mrf.mxu0 }
 0x1b3   : > { %v2604_v31 = vpop.f32.mrf.mxu0 }
 0x1dd   : > { %v1571_v12 = vpop.f32.mrf.mxu1 }
 0x1de   : > { %v1131_v14 = vadd.f32 %v1571_v12, %v857_v10 }
 0x1df   : > { %v500_v28 = vpop.f32.mrf.mxu1 }
 0x1e0   : > { %v1187_v29 = vmax.f32 %v1131_v14, 0.0  ;;  %v1130_v22 = vadd.f32 %v852_v11, %v500_v28  ;;  %v872_v14 = vadd.f32 %v2907_v9, %v871_v25  ;;  %v2610_v11 = vpop.f32.mrf.mxu0 }
 0x1e1   : > { %v1574_v30 = vpop.f32.mrf.mxu1 }
 0x1e2   : > { %1244 = vst [vmem:[%s2601_s25 + $0x8] sm:$0xff] %v1187_v29  ;;  %v1186_v10 = vmax.f32 %v1130_v22, 0.0  ;;  %v1133_v12 = vadd.f32 %v1574_v30, %v867_v15  ;;  %v887_v29 = vadd.f32 %v1696_v1, %v2907_v9 }
 0x1e3   : > { %v510_v32 = vpop.f32.mrf.mxu1 }
 0x1e4   : > { %1243 = vst [vmem:[%s2601_s25] sm:$0xff] %v1186_v10  ;;  %v1189_v33 = vmax.f32 %v1133_v12, 0.0  ;;  %v1132_v34 = vadd.f32 %v862_v24, %v510_v32  ;;  %v2616_v32 = vpop.f32.mrf.mxu0  ;;  %v892_v12 = vadd.f32 %v2907_v9, %v891_v19 }
 0x1e5   : > { %v1577_v35 = vpop.f32.mrf.mxu1 }
 0x1e6   : > { %1246 = vst [vmem:[%s2601_s25 + $0x18] sm:$0xff] %v1189_v33  ;;  %v1188_v28 = vmax.f32 %v1132_v34, 0.0  ;;  %v1135_v18 = vadd.f32 %v1577_v35, %v877_v27  ;;  %v897_v33 = vadd.f32 %v1699_v17, %v2907_v9 }
 0x1e7   : > { %v520_v22 = vpop.f32.mrf.mxu1 }
 0x1e8   : > { %1245 = vst [vmem:[%s2601_s25 + $0x10] sm:$0xff] %v1188_v28  ;;  %v1191_v15 = vmax.f32 %v1135_v18, 0.0  ;;  %v1134_v30 = vadd.f32 %v872_v14, %v520_v22  ;;  %v2622_v14 = vpop.f32.mrf.mxu0  ;;  %v907_v18 = vadd.f32 %v1702_v4, %v2907_v9 }
 0x1e9   : > { %v1580_v10 = vpop.f32.mrf.mxu1 }
 0x1ea   : > { %1248 = vst [vmem:[%s2601_s25 + $0x28] sm:$0xff] %v1191_v15  ;;  %v1190_v25 = vmax.f32 %v1134_v30, 0.0  ;;  %v1137_v24 = vadd.f32 %v1580_v10, %v887_v29  ;;  %v902_v15 = vadd.f32 %v2907_v9, %v2569_v5 }
 0x1eb   : > { %v530_v34 = vpop.f32.mrf.mxu1 }
 0x1ec   : > { %1247 = vst [vmem:[%s2601_s25 + $0x20] sm:$0xff] %v1190_v25  ;;  %v1193_v35 = vmax.f32 %v1137_v24, 0.0  ;;  %v1136_v1 = vadd.f32 %v882_v20, %v530_v34  ;;  %v2629_v20 = vpop.f32.mrf.mxu0  ;;  %v917_v25 = vadd.f32 %v2571_v21, %v2907_v9  ;;  %v912_v34 = vadd.f32 %v2907_v9, %v2573_v23 }
 0x1ed   : > { %v1583_v27 = vpop.f32.mrf.mxu1 }
 0x1ee   : > { %1250 = vst [vmem:[%s2601_s25 + $0x38] sm:$0xff] %v1193_v35  ;;  %v1192_v2 = vmax.f32 %v1136_v1, 0.0  ;;  %v1139_v28 = vadd.f32 %v1583_v27, %v897_v33  ;;  %v2637_v5 = vpop.f32.mrf.mxu0  ;;  %v927_v27 = vadd.f32 %v2575_v26, %v2907_v9 }
 0x1ef   : > { %v540_v22 = vpop.f32.mrf.mxu1 }
 0x1f0   : > { %1249 = vst [vmem:[%s2601_s25 + $0x30] sm:$0xff] %v1192_v2  ;;  %v1195_v29 = vmax.f32 %v1139_v28, 0.0  ;;  %v1138_v17 = vadd.f32 %v892_v12, %v540_v22  ;;  %v2645_v23 = vpop.f32.mrf.mxu0 }
 0x1f1   : > { %v1586_v30 = vpop.f32.mrf.mxu1 }
 0x1f2   : > { %1252 = vst [vmem:[%s2601_s25 + $0x48] sm:$0xff] %v1195_v29  ;;  %v1194_v19 = vmax.f32 %v1138_v17, 0.0  ;;  %v1141_v10 = vadd.f32 %v1586_v30, %v907_v18  ;;  %v922_v18 = vadd.f32 %v2907_v9, %v2577_v0  ;;  %v2653_v0 = vpop.f32.mrf.mxu0 }
 0x1f3   : > { %v550_v24 = vpop.f32.mrf.mxu1 }
 0x1f4   : > { %1251 = vst [vmem:[%s2601_s25 + $0x40] sm:$0xff] %v1194_v19  ;;  %v1197_v4 = vmax.f32 %v1141_v10, 0.0  ;;  %v1140_v33 = vadd.f32 %v902_v15, %v550_v24  ;;  %v937_v15 = vadd.f32 %v2579_v6, %v2907_v9  ;;  %v932_v10 = vadd.f32 %v2907_v9, %v2581_v60  ;;  %v2661_v60 = vpop.f32.mrf.mxu0 }
 0x1f5   : > { %v1589_v35 = vpop.f32.mrf.mxu1 }
 0x1f6   : > { %1254 = vst [vmem:[%s2601_s25 + $0x58] sm:$0xff] %v1197_v4  ;;  %v1196_v1 = vmax.f32 %v1140_v33, 0.0  ;;  %v1143_v12 = vadd.f32 %v1589_v35, %v917_v25  ;;  %v947_v33 = vadd.f32 %v2583_v16, %v2907_v9 }
 0x1f7   : > { %v560_v2 = vpop.f32.mrf.mxu1 }
 0x1f8   : > { %1253 = vst [vmem:[%s2601_s25 + $0x50] sm:$0xff] %v1196_v1  ;;  %v1199_v21 = vmax.f32 %v1143_v12, 0.0  ;;  %v1142_v28 = vadd.f32 %v912_v34, %v560_v2  ;;  %v942_v1 = vadd.f32 %v2907_v9, %v2585_v3  ;;  %v1735_v3 = vpop.f32.mrf.mxu0 }
 0x1f9   : > { %v1592_v22 = vpop.f32.mrf.mxu1 }
 0x1fa   : > { %1256 = vst [vmem:[%s2601_s25 + $0x68] sm:$0xff] %v1199_v21  ;;  %v1198_v29 = vmax.f32 %v1142_v28, 0.0  ;;  %v1145_v17 = vadd.f32 %v1592_v22, %v927_v27  ;;  %v957_v21 = vadd.f32 %v2587_v7, %v2907_v9  ;;  %v952_v22 = vadd.f32 %v2907_v9, %v2589_v8 }
 0x1fb   : > { %v570_v30 = vpop.f32.mrf.mxu1 }
 0x1fc   : > { %1255 = vst [vmem:[%s2601_s25 + $0x60] sm:$0xff] %v1198_v29  ;;  %v1201_v26 = vmax.f32 %v1145_v17, 0.0  ;;  %v1144_v19 = vadd.f32 %v922_v18, %v570_v30  ;;  %v967_v30 = vadd.f32 %v2593_v13, %v2907_v9 }
 0x1fd   : > { %v1595_v25 = vpop.f32.mrf.mxu1 }
 0x1fe   : > { %1258 = vst [vmem:[%s2601_s25 + $0x78] sm:$0xff] %v1201_v26  ;;  %v1200_v24 = vmax.f32 %v1144_v19, 0.0  ;;  %v1147_v4 = vadd.f32 %v1595_v25, %v937_v15 }
 0x1ff   : > { %v580_v34 = vpop.f32.mrf.mxu1 }
 0x200   : > { %1257 = vst [vmem:[%s2601_s25 + $0x70] sm:$0xff] %v1200_v24  ;;  %v1203_v6 = vmax.f32 %v1147_v4, 0.0  ;;  %v1146_v35 = vadd.f32 %v932_v10, %v580_v34  ;;  %v962_v10 = vadd.f32 %v2907_v9, %v2604_v31  ;;  %v1011_v24 = vpop.f32.mrf.mxu0 }
 0x201   : > { %v1598_v12 = vpop.f32.mrf.mxu1 }
 0x202   : > { %1260 = vst [vmem:[%s2601_s25 + $0x88] sm:$0xff] %v1203_v6  ;;  %v1202_v27 = vmax.f32 %v1146_v35, 0.0  ;;  %v1149_v2 = vadd.f32 %v1598_v12, %v947_v33  ;;  %v977_v33 = vadd.f32 %v2610_v11, %v2907_v9  ;;  %v972_v35 = vadd.f32 %v2907_v9, %v2616_v32  ;;  %v1738_v12 = vpop.f32.mrf.mxu0 }
 0x203   : > { %v590_v28 = vpop.f32.mrf.mxu1 }
 0x204   : > { %1259 = vst [vmem:[%s2601_s25 + $0x80] sm:$0xff] %v1202_v27  ;;  %v1205_v16 = vmax.f32 %v1149_v2, 0.0  ;;  %v1148_v18 = vadd.f32 %v942_v1, %v590_v28  ;;  %v987_v2 = vadd.f32 %v2622_v14, %v2907_v9 }
 0x205   : > { %v1601_v29 = vpop.f32.mrf.mxu1 }
 0x206   : > { %1262 = vst [vmem:[%s2601_s25 + $0x98] sm:$0xff] %v1205_v16  ;;  %v1204_v17 = vmax.f32 %v1148_v18, 0.0  ;;  %v1151_v15 = vadd.f32 %v1601_v29, %v957_v21  ;;  %v982_v16 = vadd.f32 %v2907_v9, %v2629_v20 }
 0x207   : > { %v600_v26 = vpop.f32.mrf.mxu1 }
 0x208   : > { %1261 = vst [vmem:[%s2601_s25 + $0x90] sm:$0xff] %v1204_v17  ;;  %v1207_v7 = vmax.f32 %v1151_v15, 0.0  ;;  %v1150_v19 = vadd.f32 %v952_v22, %v600_v26  ;;  %v1021_v22 = vpop.f32.mrf.mxu0  ;;  %v997_v17 = vadd.f32 %v2637_v5, %v2907_v9  ;;  %v992_v26 = vadd.f32 %v2907_v9, %v2645_v23 }
 0x209   : > { %v1604_v25 = vpop.f32.mrf.mxu1 }
 0x20a   : > { %1264 = vst [vmem:[%s2601_s25 + $0xa8] sm:$0xff] %v1207_v7  ;;  %v1206_v8 = vmax.f32 %v1150_v19, 0.0  ;;  %v1153_v4 = vadd.f32 %v1604_v25, %v967_v30  ;;  %v1741_v19 = vpop.f32.mrf.mxu0  ;;  %v1007_v25 = vadd.f32 %v2653_v0, %v2907_v9 }
 0x20b   : > { %v610_v34 = vpop.f32.mrf.mxu1 }
 0x20c   : > { %1263 = vst [vmem:[%s2601_s25 + $0xa0] sm:$0xff] %v1206_v8  ;;  %v1209_v13 = vmax.f32 %v1153_v4, 0.0  ;;  %v1152_v6 = vadd.f32 %v962_v10, %v610_v34 }
 0x20d   : > { %v1607_v1 = vpop.f32.mrf.mxu1 }
 0x20e   : > { %1266 = vst [vmem:[%s2601_s25 + $0xb8] sm:$0xff] %v1209_v13  ;;  %v1208_v31 = vmax.f32 %v1152_v6, 0.0  ;;  %v1155_v27 = vadd.f32 %v1607_v1, %v977_v33  ;;  %v1002_v33 = vadd.f32 %v2907_v9, %v2661_v60  ;;  %v1031_v13 = vpop.f32.mrf.mxu0 }
 0x20f   : > { %v620_v21 = vpop.f32.mrf.mxu1 }
 0x210   : > { %1265 = vst [vmem:[%s2601_s25 + $0xb0] sm:$0xff] %v1208_v31  ;;  %v1211_v11 = vmax.f32 %v1155_v27, 0.0  ;;  %v1154_v28 = vadd.f32 %v972_v35, %v620_v21  ;;  %v1017_v35 = vadd.f32 %v1735_v3, %v2907_v9  ;;  %v1012_v27 = vadd.f32 %v2907_v9, %v1011_v24  ;;  %v1744_v21 = vpop.f32.mrf.mxu0 }
 0x211   : > { %v1610_v18 = vpop.f32.mrf.mxu1 }
 0x212   : > { %1268 = vst [vmem:[%s2601_s25 + $0xc8] sm:$0xff] %v1211_v11  ;;  %v1210_v32 = vmax.f32 %v1154_v28, 0.0  ;;  %v1157_v29 = vadd.f32 %v1610_v18, %v987_v2  ;;  %v1027_v28 = vadd.f32 %v1738_v12, %v2907_v9 }
 0x213   : > { %v630_v15 = vpop.f32.mrf.mxu1 }
 0x214   : > { %1267 = vst [vmem:[%s2601_s25 + $0xc0] sm:$0xff] %v1210_v32  ;;  %v1213_v14 = vmax.f32 %v1157_v29, 0.0  ;;  %v1156_v30 = vadd.f32 %v982_v16, %v630_v15  ;;  %v1022_v32 = vadd.f32 %v2907_v9, %v1021_v22 }
 0x215   : > { %v1613_v7 = vpop.f32.mrf.mxu1 }
 0x216   : > { %1270 = vst [vmem:[%s2601_s25 + $0xd8] sm:$0xff] %v1213_v14  ;;  %v1212_v20 = vmax.f32 %v1156_v30, 0.0  ;;  %v1159_v10 = vadd.f32 %v1613_v7, %v997_v17  ;;  %v1041_v17 = vpop.f32.mrf.mxu0  ;;  %v1037_v14 = vadd.f32 %v1741_v19, %v2907_v9  ;;  %v1032_v7 = vadd.f32 %v2907_v9, %v1031_v13 }
 0x217   : > { %v640_v8 = vpop.f32.mrf.mxu1 }
 0x218   : > { %1269 = vst [vmem:[%s2601_s25 + $0xd0] sm:$0xff] %v1212_v20  ;;  %v1215_v5 = vmax.f32 %v1159_v10, 0.0  ;;  %v1158_v4 = vadd.f32 %v992_v26, %v640_v8  ;;  %v1747_v10 = vpop.f32.mrf.mxu0  ;;  %v1047_v8 = vadd.f32 %v1744_v21, %v2907_v9 }
 0x219   : > { %v1616_v34 = vpop.f32.mrf.mxu1 }
 0x21a   : > { %1272 = vst [vmem:[%s2601_s25 + $0xe8] sm:$0xff] %v1215_v5  ;;  %v1214_v23 = vmax.f32 %v1158_v4, 0.0  ;;  %v1161_v6 = vadd.f32 %v1616_v34, %v1007_v25 }
 0x21b   : > { %v650_v1 = vpop.f32.mrf.mxu1 }
 0x21c   : > { %1271 = vst [vmem:[%s2601_s25 + $0xe0] sm:$0xff] %v1214_v23  ;;  %v1217_v31 = vmax.f32 %v1161_v6, 0.0  ;;  %v1160_v0 = vadd.f32 %v1002_v33, %v650_v1  ;;  %v1042_v33 = vadd.f32 %v2907_v9, %v1041_v17  ;;  %v1051_v23 = vpop.f32.mrf.mxu0 }
 0x21d   : > { %v1619_v2 = vpop.f32.mrf.mxu1 }
 0x21e   : > { %1274 = vst [vmem:[%s2601_s25 + $0xf8] sm:$0xff] %v1217_v31  ;;  %v1216_v60 = vmax.f32 %v1160_v0, 0.0  ;;  %v1163_v11 = vadd.f32 %v1619_v2, %v1017_v35  ;;  %v1057_v35 = vadd.f32 %v1747_v10, %v2907_v9 }
 0x21f   : > { %v660_v16 = vpop.f32.mrf.mxu1 }
 0x220   : > { %1273 = vst [vmem:[%s2601_s25 + $0xf0] sm:$0xff] %v1216_v60  ;;  %v1219_v18 = vmax.f32 %v1163_v11, 0.0  ;;  %v1162_v3 = vadd.f32 %v1012_v27, %v660_v16  ;;  %v1052_v27 = vadd.f32 %v2907_v9, %v1051_v23 }
 0x221   : > { %v1622_v29 = vpop.f32.mrf.mxu1 }
 0x222   : > { %1276 = vst [vmem:[%s2601_s25 + $0x108] sm:$0xff] %v1219_v18  ;;  %v1218_v24 = vmax.f32 %v1162_v3, 0.0  ;;  %v1165_v15 = vadd.f32 %v1622_v29, %v1027_v28 }
 0x223   : > { %v670_v30 = vpop.f32.mrf.mxu1 }
 0x224   : > { %1275 = vst [vmem:[%s2601_s25 + $0x100] sm:$0xff] %v1218_v24  ;;  %v1221_v26 = vmax.f32 %v1165_v15, 0.0  ;;  %v1164_v12 = vadd.f32 %v1022_v32, %v670_v30 }
 0x225   : > { %v1625_v20 = vpop.f32.mrf.mxu1 }
 0x226   : > { %1278 = vst [vmem:[%s2601_s25 + $0x118] sm:$0xff] %v1221_v26  ;;  %v1220_v22 = vmax.f32 %v1164_v12, 0.0  ;;  %v1167_v25 = vadd.f32 %v1625_v20, %v1037_v14 }
 0x227   : > { %v680_v5 = vpop.f32.mrf.mxu1 }
 0x228   : > { %1277 = vst [vmem:[%s2601_s25 + $0x110] sm:$0xff] %v1220_v22  ;;  %v1223_v4 = vmax.f32 %v1167_v25, 0.0  ;;  %v1166_v19 = vadd.f32 %v1032_v7, %v680_v5 }
 0x229   : > { %v1628_v34 = vpop.f32.mrf.mxu1 }
 0x22a   : > { %1280 = vst [vmem:[%s2601_s25 + $0x128] sm:$0xff] %v1223_v4  ;;  %v1222_v13 = vmax.f32 %v1166_v19, 0.0  ;;  %v1169_v6 = vadd.f32 %v1628_v34, %v1047_v8 }
 0x22b   : > { %v690_v1 = vpop.f32.mrf.mxu1 }
 0x22c   : > { %1279 = vst [vmem:[%s2601_s25 + $0x120] sm:$0xff] %v1222_v13  ;;  %v1225_v31 = vmax.f32 %v1169_v6, 0.0  ;;  %v1168_v0 = vadd.f32 %v1042_v33, %v690_v1 }
 0x22d   : > { %v1631_v2 = vpop.f32.mrf.mxu1 }
 0x22e   : > { %1282 = vst [vmem:[%s2601_s25 + $0x138] sm:$0xff] %v1225_v31  ;;  %v1224_v21 = vmax.f32 %v1168_v0, 0.0  ;;  %v1171_v60 = vadd.f32 %v1631_v2, %v1057_v35 }
 0x22f   : > { %v700_v11 = vpop.f32.mrf.mxu1 }
 0x230   : > { %1281 = vst [vmem:[%s2601_s25 + $0x130] sm:$0xff] %v1224_v21  ;;  %v1227_v28 = vmax.f32 %v1171_v60, 0.0  ;;  %v1170_v16 = vadd.f32 %v1052_v27, %v700_v11 }
 0x231   : > { %v1634_v18 = vpop.f32.mrf.mxu1 }
 0x232   : > { %1284 = vst [vmem:[%s2601_s25 + $0x148] sm:$0xff] %v1227_v28  ;;  %v1226_v3 = vmax.f32 %v1170_v16, 0.0 }
 0x233   : > { %v710_v32 = vpop.f32.mrf.mxu1 }
 0x234   : > { %1283 = vst [vmem:[%s2601_s25 + $0x140] sm:$0xff] %v1226_v3 }
 0x235   : > { %v1637_v29 = vpop.f32.mrf.mxu1 }
 0x237   : > { %v720_v17 = vpop.f32.mrf.mxu1 }
 0x239   : > { %v1640_v24 = vpop.f32.mrf.mxu1 }
 0x23b   : > { %v730_v15 = vpop.f32.mrf.mxu1 }
 0x23d   : > { %v1643_v14 = vpop.f32.mrf.mxu1 }
 0x23f   : > { %v740_v30 = vpop.f32.mrf.mxu1 }
 0x241   : > { %v1646_v26 = vpop.f32.mrf.mxu1 }
 0x243   : > { %v750_v12 = vpop.f32.mrf.mxu1 }
 0x245   : > { %v1649_v7 = vpop.f32.mrf.mxu1 }
 0x247   : > { %v760_v20 = vpop.f32.mrf.mxu1 }
 0x249   : > { %v2723_v10 = vpop.f32.mrf.mxu1 }
 0x24b   : > { %v2725_v22 = vpop.f32.mrf.mxu1 }
 0x24d   : > { %v1750_v25 = vpop.f32.mrf.mxu1 }
 0x24e   : > { %v1067_v8 = vadd.f32 %v1750_v25, %v2907_v9 }
 0x24f   : > { %v1061_v5 = vpop.f32.mrf.mxu1 }
 0x250   : > { %v1173_v4 = vadd.f32 %v1634_v18, %v1067_v8  ;;  %v1062_v19 = vadd.f32 %v2907_v9, %v1061_v5 }
 0x251   : > { %v1753_v33 = vpop.f32.mrf.mxu1 }
 0x252   : > { %v1229_v34 = vmax.f32 %v1173_v4, 0.0  ;;  %v1172_v23 = vadd.f32 %v1062_v19, %v710_v32  ;;  %v1077_v13 = vadd.f32 %v1753_v33, %v2907_v9 }
 0x253   : > { %v1071_v6 = vpop.f32.mrf.mxu1 }
 0x254   : > { %1286 = vst [vmem:[%s2601_s25 + $0x158] sm:$0xff] %v1229_v34  ;;  %v1228_v35 = vmax.f32 %v1172_v23, 0.0  ;;  %v1175_v1 = vadd.f32 %v1637_v29, %v1077_v13  ;;  %v1072_v31 = vadd.f32 %v2907_v9, %v1071_v6 }
 0x255   : > { %v1756_v0 = vpop.f32.mrf.mxu1 }
 0x256   : > { %1285 = vst [vmem:[%s2601_s25 + $0x150] sm:$0xff] %v1228_v35  ;;  %v1231_v27 = vmax.f32 %v1175_v1, 0.0  ;;  %v1174_v2 = vadd.f32 %v1072_v31, %v720_v17  ;;  %v1087_v21 = vadd.f32 %v1756_v0, %v2907_v9 }
 0x257   : > { %v1081_v60 = vpop.f32.mrf.mxu1 }
 0x258   : > { %1288 = vst [vmem:[%s2601_s25 + $0x168] sm:$0xff] %v1231_v27  ;;  %v1230_v11 = vmax.f32 %v1174_v2, 0.0  ;;  %v1177_v28 = vadd.f32 %v1640_v24, %v1087_v21  ;;  %v1082_v16 = vadd.f32 %v2907_v9, %v1081_v60 }
 0x259   : > { %v1759_v18 = vpop.f32.mrf.mxu1 }
 0x25a   : > { %1287 = vst [vmem:[%s2601_s25 + $0x160] sm:$0xff] %v1230_v11  ;;  %v1233_v3 = vmax.f32 %v1177_v28, 0.0  ;;  %v1176_v32 = vadd.f32 %v1082_v16, %v730_v15  ;;  %v1097_v29 = vadd.f32 %v1759_v18, %v2907_v9 }
 0x25b   : > { %v1091_v25 = vpop.f32.mrf.mxu1 }
 0x25c   : > { %1290 = vst [vmem:[%s2601_s25 + $0x178] sm:$0xff] %v1233_v3  ;;  %v1232_v17 = vmax.f32 %v1176_v32, 0.0  ;;  %v1179_v8 = vadd.f32 %v1643_v14, %v1097_v29  ;;  %v1092_v5 = vadd.f32 %v2907_v9, %v1091_v25 }
 0x25d   : > { %v1762_v4 = vpop.f32.mrf.mxu1 }
 0x25e   : > { %1289 = vst [vmem:[%s2601_s25 + $0x170] sm:$0xff] %v1232_v17  ;;  %v1235_v24 = vmax.f32 %v1179_v8, 0.0  ;;  %v1178_v19 = vadd.f32 %v1092_v5, %v740_v30  ;;  %v1107_v33 = vadd.f32 %v1762_v4, %v2907_v9 }
 0x25f   : > { %v1101_v34 = vpop.f32.mrf.mxu1 }
 0x260   : > { %1292 = vst [vmem:[%s2601_s25 + $0x188] sm:$0xff] %v1235_v24  ;;  %v1234_v15 = vmax.f32 %v1178_v19, 0.0  ;;  %v1181_v23 = vadd.f32 %v1646_v26, %v1107_v33  ;;  %v1102_v13 = vadd.f32 %v2907_v9, %v1101_v34 }
 0x261   : > { %v1765_v6 = vpop.f32.mrf.mxu1 }
 0x262   : > { %1291 = vst [vmem:[%s2601_s25 + $0x180] sm:$0xff] %v1234_v15  ;;  %v1237_v14 = vmax.f32 %v1181_v23, 0.0  ;;  %v1180_v35 = vadd.f32 %v1102_v13, %v750_v12  ;;  %v1117_v1 = vadd.f32 %v1765_v6, %v2907_v9 }
 0x263   : > { %v1111_v31 = vpop.f32.mrf.mxu1 }
 0x264   : > { %1294 = vst [vmem:[%s2601_s25 + $0x198] sm:$0xff] %v1237_v14  ;;  %v1236_v30 = vmax.f32 %v1180_v35, 0.0  ;;  %v1183_v0 = vadd.f32 %v1649_v7, %v1117_v1  ;;  %v1112_v27 = vadd.f32 %v2907_v9, %v1111_v31 }
 0x265   : > { %v1768_v2 = vpop.f32.mrf.mxu1 }
 0x266   : > { %1293 = vst [vmem:[%s2601_s25 + $0x190] sm:$0xff] %v1236_v30  ;;  %v1239_v26 = vmax.f32 %v1183_v0, 0.0  ;;  %v1182_v21 = vadd.f32 %v1112_v27, %v760_v20  ;;  %v1127_v60 = vadd.f32 %v1768_v2, %v2907_v9 }
 0x267   : > { %v1121_v11 = vpop.f32.mrf.mxu1 }
 0x268   : > { %1296 = vst [vmem:[%s2601_s25 + $0x1a8] sm:$0xff] %v1239_v26  ;;  %v1238_v12 = vmax.f32 %v1182_v21, 0.0  ;;  %v1185_v28 = vadd.f32 %v2723_v10, %v1127_v60  ;;  %v1122_v16 = vadd.f32 %v2907_v9, %v1121_v11 }
 0x26a   : > { %1295 = vst [vmem:[%s2601_s25 + $0x1a0] sm:$0xff] %v1238_v12  ;;  %v1241_v18 = vmax.f32 %v1185_v28, 0.0  ;;  %v1184_v7 = vadd.f32 %v1122_v16, %v2725_v22  ;;  %116 = sbr.rel (!%p114_p0) target bundleno = 41 (0x29), region = 54 }
 0x26c   : > { %1298 = vst [vmem:[%s2601_s25 + $0x1b8] sm:$0x1] %v1241_v18  ;;  %v1240_v3 = vmax.f32 %v1184_v7, 0.0 }
 0x26e   : > { %1297 = vst [vmem:[%s2601_s25 + $0x1b0] sm:$0xff] %v1240_v3 }

</bundles_post_ra>
